<compile_context>
chip_gen: v5e
topology: v5e:2x2
jax: 0.10.0
libtpu: 0.0.40
codegen_flags: <defaults>
</compile_context>

<pallas_src>
import functools

import jax
import jax.numpy as jnp
from jax.experimental import pallas as pl
from jax.experimental.pallas import tpu as pltpu


# ----------------------------- architecture -----------------------------

DIMS = [2, 100, 100, 100, 98, 100, 100, 100, 100, 1]   # [in] + hidden + [out]
HPAD = 128          # hidden feature dims padded to a full lane width
MAX_TM = 2048       # row tile upper bound (review: 2048-4096; 2048 is safe)


def _softplus100(v, eup_dtype=jnp.float32):
    # torch.nn.Softplus(beta=100, threshold=20):
    #   y = x                            if 100*x > 20
    #   y = log1p(exp(100*x)) / 100      otherwise
    v = v.astype(eup_dtype)             # bf16 on v6e/v7x EUP, f32 on v5e
    z = v * 100.0
    zc = jnp.minimum(z, 20.0)           # clamp before exp: no inf in vregs
    soft = jnp.log1p(jnp.exp(zc)) * 0.01
    return jnp.where(z > 20.0, v, soft)


# ------------------------------- kernel ---------------------------------

def _sal_mlp_kernel(x_ref, wsmall_ref, wbig_ref, b_ref, o_ref, *,
                    mxu_dtype, eup_dtype):
    """Fused 9-layer MLP on one row tile.

    x_ref      : (TM, 2)          input point tile (f32)
    wsmall_ref : (2, 2, 128) f32  [0]=layer-0 W rows, [1]=layer-4 skip W rows
    wbig_ref   : (8, 128, 128)    layers 1,2,3, 4-main, 5,6,7, 8 (mxu_dtype)
    b_ref      : (9, 128) f32     biases for layers 0..8 (zero-padded)
    o_ref      : (TM, 1)          SDF prediction tile
    """
    x = x_ref[...].astype(jnp.float32)          # (TM, 2)

    def small_mm(idx):
        # K=2 matmul as VPU broadcast-FMA (VALU has slack in an EUP-bound kernel).
        w = wsmall_ref[idx]                     # (2, HPAD) f32
        return x[:, 0:1] * w[0:1, :] + x[:, 1:2] * w[1:2, :]

    def dot(a, idx):
        # bf16 (or f32) MXU inputs, f32 accumulation.
        return jnp.dot(a.astype(mxu_dtype), wbig_ref[idx],
                       preferred_element_type=jnp.float32)

    def act(v, l):
        # Last hidden softplus kept in f32 (accuracy near the zero level set).
        return _softplus100(v, eup_dtype if l < 7 else jnp.float32)

    def bias(l):
        return b_ref[l:l + 1, :]                # (1, HPAD) f32

    h = act(small_mm(0) + bias(0), 0)                    # layer 0
    for l in range(1, 4):                                # layers 1..3
        h = act(dot(h, l - 1) + bias(l), l)
    h = act(small_mm(1) + dot(h, 3) + bias(4), 4)        # layer 4 (skip concat)
    for l in range(5, 8):                                # layers 5..7
        h = act(dot(h, l - 1) + bias(l), l)
    out = dot(h, 7) + bias(8)                            # layer 8 (cols 1..127 pad)

    # TODO(synk): lane-dense (1, TM) output store (needs full network transpose).
    o_ref[...] = out[:, 0:1].astype(o_ref.dtype)


# ------------------------------- helpers ---------------------------------

def _round_up(a, b):
    return (a + b - 1) // b * b


def _cdiv(a, b):
    return (a + b - 1) // b


@functools.lru_cache(maxsize=1)
def _tpu_generation():
    """Best-effort TPU generation from device_kind; 0 if unknown."""
    try:
        kind = jax.devices()[0].device_kind.lower()
    except Exception:
        return 0
    for g in (7, 6, 5, 4, 3, 2):
        if f"v{g}" in kind or f"tpu{g}" in kind or f"tpu {g}" in kind:
            return g
    if "trillium" in kind:
        return 6
    return 0


def _choose_tm(m, n_cores):
    """Row tile: multiple of 8, <= MAX_TM.

    Single TC: one big tile (per-grid-step overhead ~0.35us, so fewer steps).
    Multi TC (v7x): keep >= 2 tiles per core so the 'parallel' axis can shard.
    """
    m8 = _round_up(max(m, 1), 8)
    if n_cores > 1:
        tm = _round_up(_cdiv(m8, 2 * n_cores), 8)
    else:
        tm = m8
    return max(8, min(MAX_TM, tm))


def _pad_to(a, shape):
    return jnp.pad(a, [(0, t - s) for t, s in zip(shape, a.shape)])


def _prep_params(params, mxu_dtype):
    """Transpose to (in,out), split layer 4 at the skip boundary, zero-pad the
    hidden dims to HPAD, and pack:
        wsmall (2,2,128) f32, wbig (8,128,128) mxu_dtype, b (9,128) f32."""
    wt = [params[f"w{l}"].T.astype(jnp.float32) for l in range(9)]   # (in, out)

    wsmall = jnp.stack([_pad_to(wt[0], (2, HPAD)),              # layer 0
                        _pad_to(wt[4][:2, :], (2, HPAD))])      # layer-4 skip rows

    big = [_pad_to(wt[l], (HPAD, HPAD)) for l in (1, 2, 3)]
    big.append(_pad_to(wt[4][2:, :], (HPAD, HPAD)))             # layer-4 main
    big += [_pad_to(wt[l], (HPAD, HPAD)) for l in (5, 6, 7)]
    big.append(_pad_to(wt[8], (HPAD, HPAD)))                    # layer 8 (cols padded)
    wbig = jnp.stack(big).astype(mxu_dtype)                     # (8, 128, 128)

    b = jnp.concatenate(
        [_pad_to(params[f"b{l}"].reshape(1, -1).astype(jnp.float32), (1, HPAD))
         for l in range(9)], axis=0)                            # (9, 128) f32
    return wsmall, wbig, b


# ------------------------------- wrapper ---------------------------------

def sal_network_forward(non_mnfld_pnts, params, use_bf16=True):
    """Pallas equivalent of SALNetwork.forward.

    non_mnfld_pnts : (..., 2) float32
    params         : dict with 'w0'..'w8' (out,in) and 'b0'..'b8' (out,)
    returns        : (prod(leading dims), 1) float32  (matches .view(-1, D))
    """
    gen = _tpu_generation()
    use_bf16_mxu = bool(use_bf16)
    use_bf16_eup = use_bf16_mxu and gen >= 6     # v5e and older: no bf16 EUP
    n_cores = 2 if gen >= 7 else 1               # v7x: 2 TensorCores / chip
    return _sal_forward(non_mnfld_pnts, params,
                        use_bf16_mxu=use_bf16_mxu,
                        use_bf16_eup=use_bf16_eup,
                        n_cores=n_cores)


@functools.partial(jax.jit,
                   static_argnames=("use_bf16_mxu", "use_bf16_eup", "n_cores"))
def _sal_forward(non_mnfld_pnts, params, *, use_bf16_mxu, use_bf16_eup, n_cores):
    x = non_mnfld_pnts.reshape(-1, non_mnfld_pnts.shape[-1]).astype(jnp.float32)
    m = x.shape[0]

    tm = _choose_tm(m, n_cores)
    m_pad = _round_up(m, tm)
    if m_pad != m:
        x = jnp.pad(x, ((0, m_pad - m), (0, 0)))

    mxu_dtype = jnp.bfloat16 if use_bf16_mxu else jnp.float32
    eup_dtype = jnp.bfloat16 if use_bf16_eup else jnp.float32
    wsmall, wbig, b = _prep_params(params, mxu_dtype)

    grid = (m_pad // tm,)

    def _const_spec(shape):
        # Constant index_map -> block DMA'd into VMEM once and kept resident.
        nd = len(shape)
        return pl.BlockSpec(shape, lambda i, _nd=nd: (0,) * _nd)

    in_specs = [
        pl.BlockSpec((tm, DIMS[0]), lambda i: (i, 0)),
        _const_spec(tuple(wsmall.shape)),
        _const_spec(tuple(wbig.shape)),
        _const_spec(tuple(b.shape)),
    ]

    param_bytes = (wsmall.size * wsmall.dtype.itemsize
                   + wbig.size * wbig.dtype.itemsize
                   + b.size * b.dtype.itemsize)
    flops_per_pt = 2 * HPAD * (2 + 3 * HPAD + (2 + HPAD) + 3 * HPAD + HPAD)
    cost = pl.CostEstimate(
        flops=flops_per_pt * m_pad,
        transcendentals=2 * 8 * HPAD * m_pad,        # exp + log per hidden elem
        bytes_accessed=12 * m_pad + int(param_bytes),
    )

    # Explicit VMEM budget (review): double-buffered I/O tiles + resident
    # params (x2) + generous headroom for compiler activation staging,
    # clamped to a range that is safe on every generation (v7x: 64 MiB phys).
    vmem_budget = (2 * 2 * int(param_bytes)
                   + 2 * (tm * DIMS[0] + tm) * 4
                   + 16 * tm * HPAD * 4)
    vmem_limit = int(min(max(vmem_budget, 32 * 1024 * 1024), 48 * 1024 * 1024))

    kernel = functools.partial(_sal_mlp_kernel,
                               mxu_dtype=mxu_dtype, eup_dtype=eup_dtype)

    out = pl.pallas_call(
        kernel,
        out_shape=jax.ShapeDtypeStruct((m_pad, 1), jnp.float32),
        grid_spec=pltpu.PrefetchScalarGridSpec(
            num_scalar_prefetch=0,
            grid=grid,
            in_specs=in_specs,
            out_specs=pl.BlockSpec((tm, 1), lambda i: (i, 0)),
        ),
        compiler_params=pltpu.CompilerParams(
            # TODO(synk): try pltpu.CORE_PARALLEL here on v7x (2 TCs) once
            # verified on hardware; 'parallel' is the safe default.
            dimension_semantics=("parallel",),
            vmem_limit_bytes=vmem_limit,
        ),
        cost_estimate=cost,
    )(x, wsmall, wbig, b)

    return out[:m]


# --------------------------- parameter init ------------------------------

def init_params(key):
    """Deterministic synthetic init (shapes follow Decoder.__init__)."""
    params = {}
    for l in range(9):
        in_dim = DIMS[l + 1] if l == 4 else DIMS[l]   # layer 4: Linear(100,100)
        out_dim = DIMS[l + 1]
        key, kw, kb = jax.random.split(key, 3)
        scale = jnp.sqrt(2.0) / jnp.sqrt(float(out_dim))
        params[f"w{l}"] = scale * jax.random.normal(kw, (out_dim, in_dim),
                                                    dtype=jnp.float32)
        params[f"b{l}"] = 0.01 * jax.random.normal(kb, (out_dim,),
                                                   dtype=jnp.float32)
    return params


# --------------------------- pure-JAX reference ---------------------------

def sal_network_reference(non_mnfld_pnts, params):
    x = non_mnfld_pnts.reshape(-1, non_mnfld_pnts.shape[-1]).astype(jnp.float32)
    skip = x
    for l in range(9):
        if l == 4:
            x = jnp.concatenate([skip, x], axis=1)
        x = x @ params[f"w{l}"].T + params[f"b{l}"]
        if l < 8:
            x = _softplus100(x)
    return x


# -------------------------------- main ------------------------------------

if __name__ == "__main__":
    key = jax.random.PRNGKey(0)
    kp, kx = jax.random.split(key)

    params = init_params(kp)
    # non-manifold points: (batch=2, n_points=8, coord_dim=2)
    non_mnfld_pnts = jax.random.normal(kx, (2, 8, 2), dtype=jnp.float32)

    ref = sal_network_reference(non_mnfld_pnts, params)

    # 1) exact-precision path (f32 MXU + f32 EUP) — validates kernel logic.
    out_f32 = jax.block_until_ready(
        sal_network_forward(non_mnfld_pnts, params, use_bf16=False))
    assert out_f32.shape == (16, 1), out_f32.shape
    err_f32 = float(jnp.max(jnp.abs(out_f32 - ref)))
    assert jnp.allclose(out_f32, ref, atol=2e-3, rtol=2e-3), (
        f"f32 path max err {err_f32}")

    # 2) fast path: bf16 MXU inputs; bf16 EUP softplus on v6e/v7x, f32 on v5e.
    out_fast = jax.block_until_ready(
        sal_network_forward(non_mnfld_pnts, params, use_bf16=True))
    assert out_fast.shape == (16, 1), out_fast.shape
    err_fast = float(jnp.max(jnp.abs(out_fast - ref)))
    assert jnp.allclose(out_fast, ref, atol=5e-2, rtol=5e-2), (
        f"fast path max err {err_fast}")

    print("KERNEL_OK")
</pallas_src>

<mosaic_0001>
module attributes {stable_mosaic.version = 11 : i64} {
  func.func @_sal_mlp_kernel(%arg0: i32, %arg1: memref<16x2xf32, #tpu.memory_space<vmem>>, %arg2: memref<2x2x128xf32, #tpu.memory_space<vmem>>, %arg3: memref<8x128x128xf32, #tpu.memory_space<vmem>>, %arg4: memref<9x128xf32, #tpu.memory_space<vmem>>, %arg5: memref<16x1xf32, #tpu.memory_space<vmem>>) attributes {dimension_semantics = [#tpu.dimension_semantics<parallel>], iteration_bounds = array<i64: 1>, scalar_prefetch = 0 : i64, scratch_operands = 0 : i64, tpu.core_type = #tpu.core_type<tc>, window_params = [{transform_indices = @transform_0, window_bounds = array<i64: 16, 2>}, {pipeline_mode = #tpu.pipeline_mode<synchronous>, transform_indices = @transform_1, window_bounds = array<i64: 2, 2, 128>}, {pipeline_mode = #tpu.pipeline_mode<synchronous>, transform_indices = @transform_2, window_bounds = array<i64: 8, 128, 128>}, {pipeline_mode = #tpu.pipeline_mode<synchronous>, transform_indices = @transform_3, window_bounds = array<i64: 9, 128>}, {transform_indices = @transform_4, window_bounds = array<i64: 16, 1>}]} {
    %c0 = arith.constant 0 : index
    %c0_0 = arith.constant 0 : index
    %0 = vector.load %arg1[%c0, %c0_0] : memref<16x2xf32, #tpu.memory_space<vmem>>, vector<16x2xf32>
    %c0_1 = arith.constant 0 : index
    %c0_2 = arith.constant 0 : index
    %c0_3 = arith.constant 0 : index
    %1 = vector.load %arg2[%c0_1, %c0_2, %c0_3] : memref<2x2x128xf32, #tpu.memory_space<vmem>>, vector<1x2x128xf32>
    %2 = vector.shape_cast %1 : vector<1x2x128xf32> to vector<2x128xf32>
    %3 = vector.extract_strided_slice %0 {offsets = [0, 0], sizes = [16, 1], strides = [1, 1]} : vector<16x2xf32> to vector<16x1xf32>
    %4 = vector.extract_strided_slice %2 {offsets = [0, 0], sizes = [1, 128], strides = [1, 1]} : vector<2x128xf32> to vector<1x128xf32>
    %5 = vector.broadcast %3 : vector<16x1xf32> to vector<16x128xf32>
    %6 = vector.broadcast %4 : vector<1x128xf32> to vector<16x128xf32>
    %7 = arith.mulf %5, %6 : vector<16x128xf32>
    %8 = vector.extract_strided_slice %0 {offsets = [0, 1], sizes = [16, 1], strides = [1, 1]} : vector<16x2xf32> to vector<16x1xf32>
    %9 = vector.extract_strided_slice %2 {offsets = [1, 0], sizes = [1, 128], strides = [1, 1]} : vector<2x128xf32> to vector<1x128xf32>
    %10 = vector.broadcast %8 : vector<16x1xf32> to vector<16x128xf32>
    %11 = vector.broadcast %9 : vector<1x128xf32> to vector<16x128xf32>
    %12 = arith.mulf %10, %11 : vector<16x128xf32>
    %13 = arith.addf %7, %12 : vector<16x128xf32>
    %c0_4 = arith.constant 0 : index
    %c0_5 = arith.constant 0 : index
    %14 = vector.load %arg4[%c0_4, %c0_5] : memref<9x128xf32, #tpu.memory_space<vmem>>, vector<1x128xf32>
    %15 = vector.broadcast %14 : vector<1x128xf32> to vector<16x128xf32>
    %16 = arith.addf %13, %15 : vector<16x128xf32>
    %cst = arith.constant 1.000000e+02 : f32
    %17 = vector.broadcast %cst : f32 to vector<16x128xf32>
    %18 = arith.mulf %16, %17 : vector<16x128xf32>
    %cst_6 = arith.constant 2.000000e+01 : f32
    %19 = vector.broadcast %cst_6 : f32 to vector<16x128xf32>
    %20 = arith.minimumf %18, %19 : vector<16x128xf32>
    %21 = math.exp %20 : vector<16x128xf32>
    %22 = math.log1p %21 : vector<16x128xf32>
    %cst_7 = arith.constant 0.00999999977 : f32
    %23 = vector.broadcast %cst_7 : f32 to vector<16x128xf32>
    %24 = arith.mulf %22, %23 : vector<16x128xf32>
    %cst_8 = arith.constant 2.000000e+01 : f32
    %25 = vector.broadcast %cst_8 : f32 to vector<16x128xf32>
    %26 = arith.cmpf ogt, %18, %25 : vector<16x128xf32>
    %27 = arith.select %26, %16, %24 : vector<16x128xi1>, vector<16x128xf32>
    %c0_9 = arith.constant 0 : index
    %c0_10 = arith.constant 0 : index
    %c0_11 = arith.constant 0 : index
    %28 = vector.load %arg3[%c0_9, %c0_10, %c0_11] : memref<8x128x128xf32, #tpu.memory_space<vmem>>, vector<1x128x128xf32>
    %29 = vector.shape_cast %28 : vector<1x128x128xf32> to vector<128x128xf32>
    %cst_12 = arith.constant dense<0.000000e+00> : vector<16x128xf32>
    %30 = tpu.matmul %27, %29, %cst_12 {dimension_numbers = #tpu.dot_dimension_numbers<[1], [0], [0], [1], [0, 0, 1, 1], [], []>} : vector<16x128xf32>, vector<128x128xf32>, vector<16x128xf32> -> vector<16x128xf32>
    %c1 = arith.constant 1 : index
    %c0_13 = arith.constant 0 : index
    %31 = vector.load %arg4[%c1, %c0_13] : memref<9x128xf32, #tpu.memory_space<vmem>>, vector<1x128xf32>
    %32 = vector.broadcast %31 : vector<1x128xf32> to vector<16x128xf32>
    %33 = arith.addf %30, %32 : vector<16x128xf32>
    %cst_14 = arith.constant 1.000000e+02 : f32
    %34 = vector.broadcast %cst_14 : f32 to vector<16x128xf32>
    %35 = arith.mulf %33, %34 : vector<16x128xf32>
    %cst_15 = arith.constant 2.000000e+01 : f32
    %36 = vector.broadcast %cst_15 : f32 to vector<16x128xf32>
    %37 = arith.minimumf %35, %36 : vector<16x128xf32>
    %38 = math.exp %37 : vector<16x128xf32>
    %39 = math.log1p %38 : vector<16x128xf32>
    %cst_16 = arith.constant 0.00999999977 : f32
    %40 = vector.broadcast %cst_16 : f32 to vector<16x128xf32>
    %41 = arith.mulf %39, %40 : vector<16x128xf32>
    %cst_17 = arith.constant 2.000000e+01 : f32
    %42 = vector.broadcast %cst_17 : f32 to vector<16x128xf32>
    %43 = arith.cmpf ogt, %35, %42 : vector<16x128xf32>
    %44 = arith.select %43, %33, %41 : vector<16x128xi1>, vector<16x128xf32>
    %c1_18 = arith.constant 1 : index
    %c0_19 = arith.constant 0 : index
    %c0_20 = arith.constant 0 : index
    %45 = vector.load %arg3[%c1_18, %c0_19, %c0_20] : memref<8x128x128xf32, #tpu.memory_space<vmem>>, vector<1x128x128xf32>
    %46 = vector.shape_cast %45 : vector<1x128x128xf32> to vector<128x128xf32>
    %cst_21 = arith.constant dense<0.000000e+00> : vector<16x128xf32>
    %47 = tpu.matmul %44, %46, %cst_21 {dimension_numbers = #tpu.dot_dimension_numbers<[1], [0], [0], [1], [0, 0, 1, 1], [], []>} : vector<16x128xf32>, vector<128x128xf32>, vector<16x128xf32> -> vector<16x128xf32>
    %c2 = arith.constant 2 : index
    %c0_22 = arith.constant 0 : index
    %48 = vector.load %arg4[%c2, %c0_22] : memref<9x128xf32, #tpu.memory_space<vmem>>, vector<1x128xf32>
    %49 = vector.broadcast %48 : vector<1x128xf32> to vector<16x128xf32>
    %50 = arith.addf %47, %49 : vector<16x128xf32>
    %cst_23 = arith.constant 1.000000e+02 : f32
    %51 = vector.broadcast %cst_23 : f32 to vector<16x128xf32>
    %52 = arith.mulf %50, %51 : vector<16x128xf32>
    %cst_24 = arith.constant 2.000000e+01 : f32
    %53 = vector.broadcast %cst_24 : f32 to vector<16x128xf32>
    %54 = arith.minimumf %52, %53 : vector<16x128xf32>
    %55 = math.exp %54 : vector<16x128xf32>
    %56 = math.log1p %55 : vector<16x128xf32>
    %cst_25 = arith.constant 0.00999999977 : f32
    %57 = vector.broadcast %cst_25 : f32 to vector<16x128xf32>
    %58 = arith.mulf %56, %57 : vector<16x128xf32>
    %cst_26 = arith.constant 2.000000e+01 : f32
    %59 = vector.broadcast %cst_26 : f32 to vector<16x128xf32>
    %60 = arith.cmpf ogt, %52, %59 : vector<16x128xf32>
    %61 = arith.select %60, %50, %58 : vector<16x128xi1>, vector<16x128xf32>
    %c2_27 = arith.constant 2 : index
    %c0_28 = arith.constant 0 : index
    %c0_29 = arith.constant 0 : index
    %62 = vector.load %arg3[%c2_27, %c0_28, %c0_29] : memref<8x128x128xf32, #tpu.memory_space<vmem>>, vector<1x128x128xf32>
    %63 = vector.shape_cast %62 : vector<1x128x128xf32> to vector<128x128xf32>
    %cst_30 = arith.constant dense<0.000000e+00> : vector<16x128xf32>
    %64 = tpu.matmul %61, %63, %cst_30 {dimension_numbers = #tpu.dot_dimension_numbers<[1], [0], [0], [1], [0, 0, 1, 1], [], []>} : vector<16x128xf32>, vector<128x128xf32>, vector<16x128xf32> -> vector<16x128xf32>
    %c3 = arith.constant 3 : index
    %c0_31 = arith.constant 0 : index
    %65 = vector.load %arg4[%c3, %c0_31] : memref<9x128xf32, #tpu.memory_space<vmem>>, vector<1x128xf32>
    %66 = vector.broadcast %65 : vector<1x128xf32> to vector<16x128xf32>
    %67 = arith.addf %64, %66 : vector<16x128xf32>
    %cst_32 = arith.constant 1.000000e+02 : f32
    %68 = vector.broadcast %cst_32 : f32 to vector<16x128xf32>
    %69 = arith.mulf %67, %68 : vector<16x128xf32>
    %cst_33 = arith.constant 2.000000e+01 : f32
    %70 = vector.broadcast %cst_33 : f32 to vector<16x128xf32>
    %71 = arith.minimumf %69, %70 : vector<16x128xf32>
    %72 = math.exp %71 : vector<16x128xf32>
    %73 = math.log1p %72 : vector<16x128xf32>
    %cst_34 = arith.constant 0.00999999977 : f32
    %74 = vector.broadcast %cst_34 : f32 to vector<16x128xf32>
    %75 = arith.mulf %73, %74 : vector<16x128xf32>
    %cst_35 = arith.constant 2.000000e+01 : f32
    %76 = vector.broadcast %cst_35 : f32 to vector<16x128xf32>
    %77 = arith.cmpf ogt, %69, %76 : vector<16x128xf32>
    %78 = arith.select %77, %67, %75 : vector<16x128xi1>, vector<16x128xf32>
    %c1_36 = arith.constant 1 : index
    %c0_37 = arith.constant 0 : index
    %c0_38 = arith.constant 0 : index
    %79 = vector.load %arg2[%c1_36, %c0_37, %c0_38] : memref<2x2x128xf32, #tpu.memory_space<vmem>>, vector<1x2x128xf32>
    %80 = vector.shape_cast %79 : vector<1x2x128xf32> to vector<2x128xf32>
    %81 = vector.extract_strided_slice %0 {offsets = [0, 0], sizes = [16, 1], strides = [1, 1]} : vector<16x2xf32> to vector<16x1xf32>
    %82 = vector.extract_strided_slice %80 {offsets = [0, 0], sizes = [1, 128], strides = [1, 1]} : vector<2x128xf32> to vector<1x128xf32>
    %83 = vector.broadcast %81 : vector<16x1xf32> to vector<16x128xf32>
    %84 = vector.broadcast %82 : vector<1x128xf32> to vector<16x128xf32>
    %85 = arith.mulf %83, %84 : vector<16x128xf32>
    %86 = vector.extract_strided_slice %0 {offsets = [0, 1], sizes = [16, 1], strides = [1, 1]} : vector<16x2xf32> to vector<16x1xf32>
    %87 = vector.extract_strided_slice %80 {offsets = [1, 0], sizes = [1, 128], strides = [1, 1]} : vector<2x128xf32> to vector<1x128xf32>
    %88 = vector.broadcast %86 : vector<16x1xf32> to vector<16x128xf32>
    %89 = vector.broadcast %87 : vector<1x128xf32> to vector<16x128xf32>
    %90 = arith.mulf %88, %89 : vector<16x128xf32>
    %91 = arith.addf %85, %90 : vector<16x128xf32>
    %c3_39 = arith.constant 3 : index
    %c0_40 = arith.constant 0 : index
    %c0_41 = arith.constant 0 : index
    %92 = vector.load %arg3[%c3_39, %c0_40, %c0_41] : memref<8x128x128xf32, #tpu.memory_space<vmem>>, vector<1x128x128xf32>
    %93 = vector.shape_cast %92 : vector<1x128x128xf32> to vector<128x128xf32>
    %cst_42 = arith.constant dense<0.000000e+00> : vector<16x128xf32>
    %94 = tpu.matmul %78, %93, %cst_42 {dimension_numbers = #tpu.dot_dimension_numbers<[1], [0], [0], [1], [0, 0, 1, 1], [], []>} : vector<16x128xf32>, vector<128x128xf32>, vector<16x128xf32> -> vector<16x128xf32>
    %95 = arith.addf %91, %94 : vector<16x128xf32>
    %c4 = arith.constant 4 : index
    %c0_43 = arith.constant 0 : index
    %96 = vector.load %arg4[%c4, %c0_43] : memref<9x128xf32, #tpu.memory_space<vmem>>, vector<1x128xf32>
    %97 = vector.broadcast %96 : vector<1x128xf32> to vector<16x128xf32>
    %98 = arith.addf %95, %97 : vector<16x128xf32>
    %cst_44 = arith.constant 1.000000e+02 : f32
    %99 = vector.broadcast %cst_44 : f32 to vector<16x128xf32>
    %100 = arith.mulf %98, %99 : vector<16x128xf32>
    %cst_45 = arith.constant 2.000000e+01 : f32
    %101 = vector.broadcast %cst_45 : f32 to vector<16x128xf32>
    %102 = arith.minimumf %100, %101 : vector<16x128xf32>
    %103 = math.exp %102 : vector<16x128xf32>
    %104 = math.log1p %103 : vector<16x128xf32>
    %cst_46 = arith.constant 0.00999999977 : f32
    %105 = vector.broadcast %cst_46 : f32 to vector<16x128xf32>
    %106 = arith.mulf %104, %105 : vector<16x128xf32>
    %cst_47 = arith.constant 2.000000e+01 : f32
    %107 = vector.broadcast %cst_47 : f32 to vector<16x128xf32>
    %108 = arith.cmpf ogt, %100, %107 : vector<16x128xf32>
    %109 = arith.select %108, %98, %106 : vector<16x128xi1>, vector<16x128xf32>
    %c4_48 = arith.constant 4 : index
    %c0_49 = arith.constant 0 : index
    %c0_50 = arith.constant 0 : index
    %110 = vector.load %arg3[%c4_48, %c0_49, %c0_50] : memref<8x128x128xf32, #tpu.memory_space<vmem>>, vector<1x128x128xf32>
    %111 = vector.shape_cast %110 : vector<1x128x128xf32> to vector<128x128xf32>
    %cst_51 = arith.constant dense<0.000000e+00> : vector<16x128xf32>
    %112 = tpu.matmul %109, %111, %cst_51 {dimension_numbers = #tpu.dot_dimension_numbers<[1], [0], [0], [1], [0, 0, 1, 1], [], []>} : vector<16x128xf32>, vector<128x128xf32>, vector<16x128xf32> -> vector<16x128xf32>
    %c5 = arith.constant 5 : index
    %c0_52 = arith.constant 0 : index
    %113 = vector.load %arg4[%c5, %c0_52] : memref<9x128xf32, #tpu.memory_space<vmem>>, vector<1x128xf32>
    %114 = vector.broadcast %113 : vector<1x128xf32> to vector<16x128xf32>
    %115 = arith.addf %112, %114 : vector<16x128xf32>
    %cst_53 = arith.constant 1.000000e+02 : f32
    %116 = vector.broadcast %cst_53 : f32 to vector<16x128xf32>
    %117 = arith.mulf %115, %116 : vector<16x128xf32>
    %cst_54 = arith.constant 2.000000e+01 : f32
    %118 = vector.broadcast %cst_54 : f32 to vector<16x128xf32>
    %119 = arith.minimumf %117, %118 : vector<16x128xf32>
    %120 = math.exp %119 : vector<16x128xf32>
    %121 = math.log1p %120 : vector<16x128xf32>
    %cst_55 = arith.constant 0.00999999977 : f32
    %122 = vector.broadcast %cst_55 : f32 to vector<16x128xf32>
    %123 = arith.mulf %121, %122 : vector<16x128xf32>
    %cst_56 = arith.constant 2.000000e+01 : f32
    %124 = vector.broadcast %cst_56 : f32 to vector<16x128xf32>
    %125 = arith.cmpf ogt, %117, %124 : vector<16x128xf32>
    %126 = arith.select %125, %115, %123 : vector<16x128xi1>, vector<16x128xf32>
    %c5_57 = arith.constant 5 : index
    %c0_58 = arith.constant 0 : index
    %c0_59 = arith.constant 0 : index
    %127 = vector.load %arg3[%c5_57, %c0_58, %c0_59] : memref<8x128x128xf32, #tpu.memory_space<vmem>>, vector<1x128x128xf32>
    %128 = vector.shape_cast %127 : vector<1x128x128xf32> to vector<128x128xf32>
    %cst_60 = arith.constant dense<0.000000e+00> : vector<16x128xf32>
    %129 = tpu.matmul %126, %128, %cst_60 {dimension_numbers = #tpu.dot_dimension_numbers<[1], [0], [0], [1], [0, 0, 1, 1], [], []>} : vector<16x128xf32>, vector<128x128xf32>, vector<16x128xf32> -> vector<16x128xf32>
    %c6 = arith.constant 6 : index
    %c0_61 = arith.constant 0 : index
    %130 = vector.load %arg4[%c6, %c0_61] : memref<9x128xf32, #tpu.memory_space<vmem>>, vector<1x128xf32>
    %131 = vector.broadcast %130 : vector<1x128xf32> to vector<16x128xf32>
    %132 = arith.addf %129, %131 : vector<16x128xf32>
    %cst_62 = arith.constant 1.000000e+02 : f32
    %133 = vector.broadcast %cst_62 : f32 to vector<16x128xf32>
    %134 = arith.mulf %132, %133 : vector<16x128xf32>
    %cst_63 = arith.constant 2.000000e+01 : f32
    %135 = vector.broadcast %cst_63 : f32 to vector<16x128xf32>
    %136 = arith.minimumf %134, %135 : vector<16x128xf32>
    %137 = math.exp %136 : vector<16x128xf32>
    %138 = math.log1p %137 : vector<16x128xf32>
    %cst_64 = arith.constant 0.00999999977 : f32
    %139 = vector.broadcast %cst_64 : f32 to vector<16x128xf32>
    %140 = arith.mulf %138, %139 : vector<16x128xf32>
    %cst_65 = arith.constant 2.000000e+01 : f32
    %141 = vector.broadcast %cst_65 : f32 to vector<16x128xf32>
    %142 = arith.cmpf ogt, %134, %141 : vector<16x128xf32>
    %143 = arith.select %142, %132, %140 : vector<16x128xi1>, vector<16x128xf32>
    %c6_66 = arith.constant 6 : index
    %c0_67 = arith.constant 0 : index
    %c0_68 = arith.constant 0 : index
    %144 = vector.load %arg3[%c6_66, %c0_67, %c0_68] : memref<8x128x128xf32, #tpu.memory_space<vmem>>, vector<1x128x128xf32>
    %145 = vector.shape_cast %144 : vector<1x128x128xf32> to vector<128x128xf32>
    %cst_69 = arith.constant dense<0.000000e+00> : vector<16x128xf32>
    %146 = tpu.matmul %143, %145, %cst_69 {dimension_numbers = #tpu.dot_dimension_numbers<[1], [0], [0], [1], [0, 0, 1, 1], [], []>} : vector<16x128xf32>, vector<128x128xf32>, vector<16x128xf32> -> vector<16x128xf32>
    %c7 = arith.constant 7 : index
    %c0_70 = arith.constant 0 : index
    %147 = vector.load %arg4[%c7, %c0_70] : memref<9x128xf32, #tpu.memory_space<vmem>>, vector<1x128xf32>
    %148 = vector.broadcast %147 : vector<1x128xf32> to vector<16x128xf32>
    %149 = arith.addf %146, %148 : vector<16x128xf32>
    %cst_71 = arith.constant 1.000000e+02 : f32
    %150 = vector.broadcast %cst_71 : f32 to vector<16x128xf32>
    %151 = arith.mulf %149, %150 : vector<16x128xf32>
    %cst_72 = arith.constant 2.000000e+01 : f32
    %152 = vector.broadcast %cst_72 : f32 to vector<16x128xf32>
    %153 = arith.minimumf %151, %152 : vector<16x128xf32>
    %154 = math.exp %153 : vector<16x128xf32>
    %155 = math.log1p %154 : vector<16x128xf32>
    %cst_73 = arith.constant 0.00999999977 : f32
    %156 = vector.broadcast %cst_73 : f32 to vector<16x128xf32>
    %157 = arith.mulf %155, %156 : vector<16x128xf32>
    %cst_74 = arith.constant 2.000000e+01 : f32
    %158 = vector.broadcast %cst_74 : f32 to vector<16x128xf32>
    %159 = arith.cmpf ogt, %151, %158 : vector<16x128xf32>
    %160 = arith.select %159, %149, %157 : vector<16x128xi1>, vector<16x128xf32>
    %c7_75 = arith.constant 7 : index
    %c0_76 = arith.constant 0 : index
    %c0_77 = arith.constant 0 : index
    %161 = vector.load %arg3[%c7_75, %c0_76, %c0_77] : memref<8x128x128xf32, #tpu.memory_space<vmem>>, vector<1x128x128xf32>
    %162 = vector.shape_cast %161 : vector<1x128x128xf32> to vector<128x128xf32>
    %cst_78 = arith.constant dense<0.000000e+00> : vector<16x128xf32>
    %163 = tpu.matmul %160, %162, %cst_78 {dimension_numbers = #tpu.dot_dimension_numbers<[1], [0], [0], [1], [0, 0, 1, 1], [], []>} : vector<16x128xf32>, vector<128x128xf32>, vector<16x128xf32> -> vector<16x128xf32>
    %c8 = arith.constant 8 : index
    %c0_79 = arith.constant 0 : index
    %164 = vector.load %arg4[%c8, %c0_79] : memref<9x128xf32, #tpu.memory_space<vmem>>, vector<1x128xf32>
    %165 = vector.broadcast %164 : vector<1x128xf32> to vector<16x128xf32>
    %166 = arith.addf %163, %165 : vector<16x128xf32>
    %167 = vector.extract_strided_slice %166 {offsets = [0, 0], sizes = [16, 1], strides = [1, 1]} : vector<16x128xf32> to vector<16x1xf32>
    %c0_80 = arith.constant 0 : index
    %c0_81 = arith.constant 0 : index
    %168 = vector.load %arg5[%c0_80, %c0_81] : memref<16x1xf32, #tpu.memory_space<vmem>>, vector<16x1xf32>
    tpu.vector_store %arg5[%c0_80, %c0_81], %167 {strides = array<i32>} : memref<16x1xf32, #tpu.memory_space<vmem>>, vector<16x1xf32>,
    return
  }
  func.func @transform_0(%arg0: i32) -> (i32, i32) {
    %c0_i32 = arith.constant 0 : i32
    %c0_i32_0 = arith.constant 0 : i32
    return %arg0, %c0_i32 : i32, i32
  }
  func.func @transform_1(%arg0: i32) -> (i32, i32, i32) {
    %c0_i32 = arith.constant 0 : i32
    %c0_i32_0 = arith.constant 0 : i32
    %c0_i32_1 = arith.constant 0 : i32
    %c0_i32_2 = arith.constant 0 : i32
    return %c0_i32, %c0_i32_0, %c0_i32_1 : i32, i32, i32
  }
  func.func @transform_2(%arg0: i32) -> (i32, i32, i32) {
    %c0_i32 = arith.constant 0 : i32
    %c0_i32_0 = arith.constant 0 : i32
    %c0_i32_1 = arith.constant 0 : i32
    %c0_i32_2 = arith.constant 0 : i32
    return %c0_i32, %c0_i32_0, %c0_i32_1 : i32, i32, i32
  }
  func.func @transform_3(%arg0: i32) -> (i32, i32) {
    %c0_i32 = arith.constant 0 : i32
    %c0_i32_0 = arith.constant 0 : i32
    %c0_i32_1 = arith.constant 0 : i32
    return %c0_i32, %c0_i32_0 : i32, i32
  }
  func.func @transform_4(%arg0: i32) -> (i32, i32) {
    %c0_i32 = arith.constant 0 : i32
    %c0_i32_0 = arith.constant 0 : i32
    return %arg0, %c0_i32 : i32, i32
  }
}

</mosaic_0001>

<bundles_post_ra>
// kernel: _sal_forward.1
= control target key start
LH: loop header
LB: loop body
LE: loop exit
PB: predicated region body
PF: predicated region fallthrough
CT: control target
= control target key end

     0   :  { %v854_v0 = vmov 0   ;;  %v855_v3 = vmov 1   ;;  %s1316_s0 = inlined_call_operand.vmem [shape: f32[16,2], index: 0, kind: input, shape index: {}]   ;;  %s1317_s3 = inlined_call_operand.vmem [shape: f32[9,128], index: 3, kind: input, shape index: {}]   ;;  %s1318_s2 = inlined_call_operand.vmem [shape: f32[8,128,128], index: 2, kind: input, shape index: {}]   ;;  %s1319_s1 = inlined_call_operand.vmem [shape: f32[2,2,128], index: 1, kind: input, shape index: {}]   ;;  %s1320_s4 = inlined_call_operand.vmem [shape: f32[16,1], index: 4, kind: output, shape index: {}]  }
   0x1   :  { %779 = vset.pattern.permute.xlu1 %v854_v0  ;;  %777 = vset.pattern.permute.xlu0 %v854_v0  ;;  %v18_v1 = vld [vmem:[%s1316_s0 + $0x8] sm:$0xff]  ;;  %v17_v2 = vld [vmem:[%s1316_s0] sm:$0xff]  ;;  %v97_v4 = vld [vmem:[%s1318_s2 + $0x78] sm:$0xff] }
   0x2   :  { %27 = vperm.xlu1 %779, %v18_v1   ;;  %22 = vperm.xlu0 %777, %v17_v2   ;;  %v96_v5 = vld [vmem:[%s1318_s2 + $0x70] sm:$0xff]  ;;  %v95_v6 = vld [vmem:[%s1318_s2 + $0x68] sm:$0xff]  ;;  %v94_v7 = vld [vmem:[%s1318_s2 + $0x60] sm:$0xff] }
   0x3   :  { %100 = vmatpush.msra.mxu0 %v97_v4  ;;  %v93_v8 = vld [vmem:[%s1318_s2 + $0x58] sm:$0xff]  ;;  %v92_v9 = vld [vmem:[%s1318_s2 + $0x50] sm:$0xff]  ;;  %v91_v10 = vld [vmem:[%s1318_s2 + $0x48] sm:$0xff] }
   0x4   :  { %v90_v11 = vld [vmem:[%s1318_s2 + $0x40] sm:$0xff]  ;;  %v89_v13 = vld [vmem:[%s1318_s2 + $0x38] sm:$0xff]  ;;  %v88_v14 = vld [vmem:[%s1318_s2 + $0x30] sm:$0xff] }
   0x5   :  { %101 = vmatpush.msra.mxu0 %v96_v5  ;;  %v694_v12 = vld [vmem:[%s1319_s1 + $0x2] sm:$0x3]  ;;  %v87_v16 = vld [vmem:[%s1318_s2 + $0x28] sm:$0xff]  ;;  %v19_v22 = vld [vmem:[%s1319_s1] sm:$0x3] }
   0x6   :  { %v305_v15 = vperm.slane %v694_v12, 0  ;;  %v86_v19 = vld [vmem:[%s1318_s2 + $0x20] sm:$0xff]  ;;  %v85_v23 = vld [vmem:[%s1318_s2 + $0x18] sm:$0xff]  ;;  %v84_v24 = vld [vmem:[%s1318_s2 + $0x10] sm:$0xff]  ;;  %v30_v25 = vperm.slane %v19_v22, 0  ;;  %v41_v26 = vperm.slane %v19_v22, 1 }
   0x7   :  { %102 = vmatpush.msra.mxu0 %v95_v6  ;;  %v308_v27 = vperm.slane %v694_v12, 1  ;;  %v83_v28 = vld [vmem:[%s1318_s2 + $0x8] sm:$0xff]  ;;  %v82_v30 = vld [vmem:[%s1318_s2] sm:$0xff]  ;;  %v664_v22 = vld [vmem:[%s1318_s2 + $0x90] sm:$0xff] }
   0x8   :  { %v781_v34 = vld [vmem:[%s1317_s3] ss:$0 sm:$0xff] }
   0x9   :  { %103 = vmatpush.msra.mxu0 %v94_v7  ;;  %v674_v12 = vld [vmem:[%s1318_s2 + $0xe0] sm:$0xff] }
   0xa   :  { %780 = vset.pattern.permute.xlu1 %v855_v3  ;;  %778 = vset.pattern.permute.xlu0 %v855_v3 }
   0xb   :  { %38 = vperm.xlu1 %780, %v18_v1   ;;  %34 = vperm.xlu0 %778, %v17_v2  }
   0xc   :  { %104 = vmatpush.msra.mxu0 %v93_v8 }
   0xe   :  { %105 = vmatpush.msra.mxu0 %v92_v9  ;;  %v677_v9 = vld [vmem:[%s1318_s2 + $0xf8] sm:$0xff] }
   0xf   :  { %174 = vmatpush.msra.mxu1 %v677_v9  ;;  %v680_v9 = vld [vmem:[%s1318_s2 + $0x110] sm:$0xff] }
  0x10   :  { %106 = vmatpush.msra.mxu0 %v91_v10  ;;  %v676_v10 = vld [vmem:[%s1318_s2 + $0xf0] sm:$0xff] }
  0x11   :  { %175 = vmatpush.msra.mxu1 %v676_v10  ;;  %v679_v10 = vld [vmem:[%s1318_s2 + $0x108] sm:$0xff] }
  0x12   :  { %107 = vmatpush.msra.mxu0 %v90_v11  ;;  %v675_v11 = vld [vmem:[%s1318_s2 + $0xe8] sm:$0xff] }
  0x13   :  { %176 = vmatpush.msra.mxu1 %v675_v11  ;;  %v678_v11 = vld [vmem:[%s1318_s2 + $0x100] sm:$0xff] }
  0x14   :  { %108 = vmatpush.msra.mxu0 %v89_v13  ;;  %v673_v13 = vld [vmem:[%s1318_s2 + $0xd8] sm:$0xff] }
  0x15   :  { %177 = vmatpush.msra.mxu1 %v674_v12  ;;  %v783_v12 = vld [vmem:[%s1317_s3 + $0x2] ss:$0 sm:$0xff] }
  0x16   :  { %109 = vmatpush.msra.mxu0 %v88_v14  ;;  %v672_v14 = vld [vmem:[%s1318_s2 + $0xd0] sm:$0xff] }
  0x17   :  { %178 = vmatpush.msra.mxu1 %v673_v13 }
  0x18   :  { %110 = vmatpush.msra.mxu0 %v87_v16  ;;  %v670_v16 = vld [vmem:[%s1318_s2 + $0xc0] sm:$0xff] }
  0x19   :  { %179 = vmatpush.msra.mxu1 %v672_v14 }
  0x1a   :  { %111 = vmatpush.msra.mxu0 %v86_v19  ;;  %v667_v19 = vld [vmem:[%s1318_s2 + $0xa8] sm:$0xff] }
  0x1c   :  { %112 = vmatpush.msra.mxu0 %v85_v23  ;;  %v663_v23 = vld [vmem:[%s1318_s2 + $0x88] sm:$0xff] }
  0x1e   :  { %113 = vmatpush.msra.mxu0 %v84_v24  ;;  %v662_v24 = vld [vmem:[%s1318_s2 + $0x80] sm:$0xff] }
  0x20   :  { %114 = vmatpush.msra.mxu0 %v83_v28 }
  0x22   :  { %115 = vmatpush.msra.mxu0 %v82_v30 }
  0x74   :  { %v23_v17 = vpop.permute.xlu0 %22  ;;  %v28_v18 = vpop.permute.xlu1 %27 }
  0x75   :  { %v306_v20 = vmul.f32 %v305_v15, %v23_v17  ;;  %v307_v21 = vmul.f32 %v305_v15, %v28_v18  ;;  %v32_v29 = vmul.f32 %v30_v25, %v28_v18  ;;  %v31_v31 = vmul.f32 %v30_v25, %v23_v17  ;;  %v671_v15 = vld [vmem:[%s1318_s2 + $0xc8] sm:$0xff]  ;;  %v669_v17 = vld [vmem:[%s1318_s2 + $0xb8] sm:$0xff]  ;;  %v668_v18 = vld [vmem:[%s1318_s2 + $0xb0] sm:$0xff] }
  0x76   :  { %180 = vmatpush.msra.mxu1 %v671_v15  ;;  %v782_v25 = vld [vmem:[%s1317_s3 + $0x1] ss:$0 sm:$0xff] }
  0x78   :  { %181 = vmatpush.msra.mxu1 %v670_v16 }
  0x7a   :  { %182 = vmatpush.msra.mxu1 %v669_v17 }
  0x7c   :  { %183 = vmatpush.msra.mxu1 %v668_v18 }
  0x7d   :  { %v39_v32 = vpop.permute.xlu1 %38  ;;  %v35_v33 = vpop.permute.xlu0 %34 }
  0x7e   :  { %v43_v35 = vmul.f32 %v41_v26, %v39_v32  ;;  %v310_v36 = vmul.f32 %v308_v27, %v39_v32  ;;  %v42_v37 = vmul.f32 %v41_v26, %v35_v33  ;;  %v309_v38 = vmul.f32 %v308_v27, %v35_v33  ;;  %184 = vmatpush.msra.mxu1 %v667_v19 }
  0x80   :  { %v45_v39 = vadd.f32 %v43_v35, %v32_v29  ;;  %v44_v40 = vadd.f32 %v42_v37, %v31_v31  ;;  %v944_v41 = vadd.f32 %v309_v38, %v306_v20  ;;  %v946_v42 = vadd.f32 %v310_v36, %v307_v21  ;;  %v666_v20 = vld [vmem:[%s1318_s2 + $0xa0] sm:$0xff]  ;;  %v665_v21 = vld [vmem:[%s1318_s2 + $0x98] sm:$0xff] }
  0x81   :  { %185 = vmatpush.msra.mxu1 %v666_v20 }
  0x82   :  { %v49_v43 = vadd.f32 %v781_v34, %v45_v39  ;;  %v48_v44 = vadd.f32 %v781_v34, %v44_v40 }
  0x83   :  { %186 = vmatpush.msra.mxu1 %v665_v21 }
  0x84   :  { %v50_v45 = vmul.f32 100.0, %v48_v44  ;;  %v51_v46 = vmul.f32 100.0, %v49_v43 }
  0x85   :  { %187 = vmatpush.msra.mxu1 %v664_v22 }
  0x86   :  { %v52_v47 = vmin.f32 %v50_v45, 20.0  ;;  %v53_v48 = vmin.f32 %v51_v46, 20.0  ;;  %vm78_vm1 = vcmp.gt.f32.partialorder %v50_v45, 20.0  ;;  %vm79_vm3 = vcmp.gt.f32.partialorder %v51_v46, 20.0 }
  0x87   :  { %188 = vmatpush.msra.mxu1 %v663_v23 }
  0x88   :  { %v54_v49 = vmul.f32 1.442695, %v52_v47  ;;  %v56_v50 = vmul.f32 1.442695, %v53_v48 }
  0x89   :  { %189 = vmatpush.msra.mxu1 %v662_v24 }
  0x8a   :  { %790 = vpow2.f32 %v54_v49 }
  0x8b   :  { %792 = vpow2.f32 %v56_v50 }
  0x90   :  { %v791_v51 = vpop.eup %790 }
  0x91   :  { %v793_v52 = vpop.eup %792  ;;  %v58_v53 = vadd.f32 1.0, %v791_v51  ;;  %v61_v54 = vmul.f32 -0.5, %v791_v51  ;;  %v64_v58 = vand.u32 2147483647, %v791_v51 }
  0x92   :  { %v67_v55 = vadd.f32 1.0, %v793_v52  ;;  %v70_v57 = vmul.f32 -0.5, %v793_v52  ;;  %v73_v0 = vand.u32 2147483647, %v793_v52 }
  0x93   :  { %794 = vlog2.f32 %v58_v53  ;;  %v62_v56 = vadd.f32 1.0, %v61_v54  ;;  %vm65_vm0 = vcmp.lt.f32.partialorder %v64_v58, 0.0004427343 }
  0x94   :  { %796 = vlog2.f32 %v67_v55  ;;  %v71_v63 = vadd.f32 1.0, %v70_v57  ;;  %vm74_vm2 = vcmp.lt.f32.partialorder %v73_v0, 0.0004427343  ;;  %v689_v0 = vld [vmem:[%s1318_s2 + $0x158] sm:$0xff] }
  0x95   :  { %v63_v62 = vmul.f32 %v791_v51, %v62_v56 }
  0x96   :  { %v72_v4 = vmul.f32 %v793_v52, %v71_v63  ;;  %v690_v63 = vld [vmem:[%s1318_s2 + $0x160] sm:$0xff] }
  0x99   :  { %v795_v59 = vpop.eup %794 }
  0x9a   :  { %v797_v60 = vpop.eup %796  ;;  %v60_v61 = vmul.f32 0.6931472, %v795_v59 }
  0x9b   :  { %v69_v2 = vmul.f32 0.6931472, %v797_v60  ;;  %v693_v60 = vld [vmem:[%s1318_s2 + $0x178] sm:$0xff] }
  0x9c   :  { %v66_v1 = vsel %vm65_vm0, %v63_v62, %v60_v61  ;;  %248 = vmatpush.msra.mxu2 %v693_v60  ;;  %v692_v61 = vld [vmem:[%s1318_s2 + $0x170] sm:$0xff]  ;;  %v691_v62 = vld [vmem:[%s1318_s2 + $0x168] sm:$0xff] }
  0x9d   :  { %v76_v3 = vmul.f32 0.01, %v66_v1  ;;  %v75_v6 = vsel %vm74_vm2, %v72_v4, %v69_v2  ;;  %v688_v1 = vld [vmem:[%s1318_s2 + $0x150] sm:$0xff]  ;;  %v687_v2 = vld [vmem:[%s1318_s2 + $0x148] sm:$0xff]  ;;  %v685_v4 = vld [vmem:[%s1318_s2 + $0x138] sm:$0xff] }
  0x9e   :  { %v77_v7 = vmul.f32 0.01, %v75_v6  ;;  %249 = vmatpush.msra.mxu2 %v692_v61  ;;  %v683_v6 = vld [vmem:[%s1318_s2 + $0x128] sm:$0xff]  ;;  %v697_v60 = vld [vmem:[%s1318_s2 + $0x190] sm:$0xff] }
  0x9f   :  { %v80_v5 = vsel %vm78_vm1, %v48_v44, %v76_v3  ;;  %v686_v3 = vld [vmem:[%s1318_s2 + $0x140] sm:$0xff]  ;;  %v696_v61 = vld [vmem:[%s1318_s2 + $0x188] sm:$0xff] }
  0xa0   :  { %116 = vmatmul.f32.vlgmr.msra.gmra.mxu0 %v80_v5  ;;  %v81_v8 = vsel %vm79_vm3, %v49_v43, %v77_v7  ;;  %250 = vmatpush.msra.mxu2 %v691_v62  ;;  %v684_v5 = vld [vmem:[%s1318_s2 + $0x130] sm:$0xff]  ;;  %v682_v7 = vld [vmem:[%s1318_s2 + $0x120] sm:$0xff] }
  0xa1   :  { %v695_v62 = vld [vmem:[%s1318_s2 + $0x180] sm:$0xff] }
  0xa2   :  { %251 = vmatpush.msra.mxu2 %v690_v63  ;;  %v784_v63 = vld [vmem:[%s1317_s3 + $0x3] ss:$0 sm:$0xff] }
  0xa4   :  { %252 = vmatpush.msra.mxu2 %v689_v0 }
  0xa6   :  { %253 = vmatpush.msra.mxu2 %v688_v1 }
  0xa8   :  { %119 = vmatmul.f32.gmra.mxu0 %v81_v8  ;;  %254 = vmatpush.msra.mxu2 %v687_v2  ;;  %v681_v8 = vld [vmem:[%s1318_s2 + $0x118] sm:$0xff] }
  0xaa   :  { %255 = vmatpush.msra.mxu2 %v686_v3 }
  0xac   :  { %256 = vmatpush.msra.mxu2 %v685_v4 }
  0xae   :  { %257 = vmatpush.msra.mxu2 %v684_v5 }
  0xb0   :  { %258 = vmatpush.msra.mxu2 %v683_v6 }
  0xb2   :  { %259 = vmatpush.msra.mxu2 %v682_v7 }
  0xb4   :  { %260 = vmatpush.msra.mxu2 %v681_v8 }
  0xb6   :  { %261 = vmatpush.msra.mxu2 %v680_v9 }
  0xb8   :  { %262 = vmatpush.msra.mxu2 %v679_v10 }
  0xba   :  { %263 = vmatpush.msra.mxu2 %v678_v11 }
 0x11d   :  { %v117_v26 = vpop.f32.mrf.mxu0 }
 0x11e   :  { %v118_v27 = vadd.f32 %v782_v25, %v117_v26 }
 0x120   :  { %v123_v28 = vmul.f32 100.0, %v118_v27 }
 0x122   :  { %v125_v29 = vmin.f32 %v123_v28, 20.0  ;;  %vm151_vm5 = vcmp.gt.f32.partialorder %v123_v28, 20.0 }
 0x124   :  { %v127_v30 = vmul.f32 1.442695, %v125_v29 }
 0x125   :  { %v120_v31 = vpop.f32.mrf.mxu0 }
 0x126   :  { %798 = vpow2.f32 %v127_v30  ;;  %v121_v32 = vadd.f32 %v782_v25, %v120_v31 }
 0x128   :  { %v124_v33 = vmul.f32 100.0, %v121_v32 }
 0x12a   :  { %v126_v34 = vmin.f32 %v124_v33, 20.0  ;;  %vm152_vm7 = vcmp.gt.f32.partialorder %v124_v33, 20.0 }
 0x12c   :  { %v799_v35 = vpop.eup %798  ;;  %v129_v36 = vmul.f32 1.442695, %v126_v34 }
 0x12d   :  { %v131_v37 = vadd.f32 1.0, %v799_v35  ;;  %v134_v38 = vmul.f32 -0.5, %v799_v35  ;;  %v137_v40 = vand.u32 2147483647, %v799_v35 }
 0x12e   :  { %800 = vpow2.f32 %v129_v36 }
 0x12f   :  { %802 = vlog2.f32 %v131_v37  ;;  %v135_v39 = vadd.f32 1.0, %v134_v38  ;;  %vm138_vm4 = vcmp.lt.f32.partialorder %v137_v40, 0.0004427343 }
 0x131   :  { %v136_v47 = vmul.f32 %v799_v35, %v135_v39 }
 0x134   :  { %v801_v43 = vpop.eup %800 }
 0x135   :  { %v803_v44 = vpop.eup %802  ;;  %v140_v45 = vadd.f32 1.0, %v801_v43  ;;  %v143_v48 = vmul.f32 -0.5, %v801_v43  ;;  %v146_v53 = vand.u32 2147483647, %v801_v43 }
 0x136   :  { %v133_v46 = vmul.f32 0.6931472, %v803_v44 }
 0x137   :  { %804 = vlog2.f32 %v140_v45  ;;  %v144_v51 = vadd.f32 1.0, %v143_v48  ;;  %vm147_vm6 = vcmp.lt.f32.partialorder %v146_v53, 0.0004427343  ;;  %v709_v48 = vld [vmem:[%s1318_s2 + $0x1f0] sm:$0xff]  ;;  %v704_v53 = vld [vmem:[%s1318_s2 + $0x1c8] sm:$0xff] }
 0x138   :  { %v139_v49 = vsel %vm138_vm4, %v136_v47, %v133_v46  ;;  %v710_v47 = vld [vmem:[%s1318_s2 + $0x1f8] sm:$0xff] }
 0x139   :  { %v149_v50 = vmul.f32 0.01, %v139_v49  ;;  %v145_v56 = vmul.f32 %v801_v43, %v144_v51  ;;  %330 = vmatpush.msra.mxu3 %v710_v47  ;;  %v708_v49 = vld [vmem:[%s1318_s2 + $0x1e8] sm:$0xff]  ;;  %v706_v51 = vld [vmem:[%s1318_s2 + $0x1d8] sm:$0xff]  ;;  %v713_v47 = vld [vmem:[%s1318_s2 + $0x210] sm:$0xff] }
 0x13b   :  { %v153_v52 = vsel %vm151_vm5, %v118_v27, %v149_v50  ;;  %331 = vmatpush.msra.mxu3 %v709_v48  ;;  %v707_v50 = vld [vmem:[%s1318_s2 + $0x1e0] sm:$0xff]  ;;  %v712_v48 = vld [vmem:[%s1318_s2 + $0x208] sm:$0xff] }
 0x13c   :  { %190 = vmatmul.f32.vlgmr.msra.gmra.mxu1 %v153_v52  ;;  %v705_v52 = vld [vmem:[%s1318_s2 + $0x1d0] sm:$0xff] }
 0x13d   :  { %v805_v54 = vpop.eup %804  ;;  %332 = vmatpush.msra.mxu3 %v708_v49  ;;  %v711_v49 = vld [vmem:[%s1318_s2 + $0x200] sm:$0xff] }
 0x13e   :  { %v142_v55 = vmul.f32 0.6931472, %v805_v54  ;;  %v703_v54 = vld [vmem:[%s1318_s2 + $0x1c0] sm:$0xff] }
 0x13f   :  { %333 = vmatpush.msra.mxu3 %v707_v50  ;;  %v785_v50 = vld [vmem:[%s1317_s3 + $0x4] ss:$0 sm:$0xff] }
 0x140   :  { %v148_v57 = vsel %vm147_vm6, %v145_v56, %v142_v55  ;;  %v702_v55 = vld [vmem:[%s1318_s2 + $0x1b8] sm:$0xff]  ;;  %v701_v56 = vld [vmem:[%s1318_s2 + $0x1b0] sm:$0xff] }
 0x141   :  { %v150_v58 = vmul.f32 0.01, %v148_v57  ;;  %334 = vmatpush.msra.mxu3 %v706_v51  ;;  %v700_v57 = vld [vmem:[%s1318_s2 + $0x1a8] sm:$0xff] }
 0x143   :  { %v154_v59 = vsel %vm152_vm7, %v121_v32, %v150_v58  ;;  %335 = vmatpush.msra.mxu3 %v705_v52  ;;  %v699_v58 = vld [vmem:[%s1318_s2 + $0x1a0] sm:$0xff] }
 0x144   :  { %193 = vmatmul.f32.gmra.mxu1 %v154_v59  ;;  %v698_v59 = vld [vmem:[%s1318_s2 + $0x198] sm:$0xff] }
 0x145   :  { %336 = vmatpush.msra.mxu3 %v704_v53 }
 0x147   :  { %337 = vmatpush.msra.mxu3 %v703_v54 }
 0x149   :  { %338 = vmatpush.msra.mxu3 %v702_v55 }
 0x14b   :  { %339 = vmatpush.msra.mxu3 %v701_v56 }
 0x14d   :  { %340 = vmatpush.msra.mxu3 %v700_v57 }
 0x14f   :  { %341 = vmatpush.msra.mxu3 %v699_v58 }
 0x151   :  { %342 = vmatpush.msra.mxu3 %v698_v59 }
 0x153   :  { %343 = vmatpush.msra.mxu3 %v697_v60 }
 0x155   :  { %344 = vmatpush.msra.mxu3 %v696_v61 }
 0x157   :  { %345 = vmatpush.msra.mxu3 %v695_v62 }
 0x1b9   :  { %v191_v13 = vpop.f32.mrf.mxu1 }
 0x1ba   :  { %v192_v14 = vadd.f32 %v783_v12, %v191_v13 }
 0x1bc   :  { %v197_v15 = vmul.f32 100.0, %v192_v14 }
 0x1be   :  { %v199_v16 = vmin.f32 %v197_v15, 20.0  ;;  %vm225_vm9 = vcmp.gt.f32.partialorder %v197_v15, 20.0 }
 0x1c0   :  { %v201_v17 = vmul.f32 1.442695, %v199_v16 }
 0x1c1   :  { %v194_v18 = vpop.f32.mrf.mxu1 }
 0x1c2   :  { %806 = vpow2.f32 %v201_v17  ;;  %v195_v19 = vadd.f32 %v783_v12, %v194_v18 }
 0x1c4   :  { %v198_v20 = vmul.f32 100.0, %v195_v19 }
 0x1c6   :  { %v200_v21 = vmin.f32 %v198_v20, 20.0  ;;  %vm226_vm11 = vcmp.gt.f32.partialorder %v198_v20, 20.0 }
 0x1c8   :  { %v807_v22 = vpop.eup %806  ;;  %v203_v23 = vmul.f32 1.442695, %v200_v21 }
 0x1c9   :  { %v205_v24 = vadd.f32 1.0, %v807_v22  ;;  %v208_v25 = vmul.f32 -0.5, %v807_v22  ;;  %v211_v27 = vand.u32 2147483647, %v807_v22 }
 0x1ca   :  { %808 = vpow2.f32 %v203_v23 }
 0x1cb   :  { %810 = vlog2.f32 %v205_v24  ;;  %v209_v26 = vadd.f32 1.0, %v208_v25  ;;  %vm212_vm8 = vcmp.lt.f32.partialorder %v211_v27, 0.0004427343 }
 0x1cd   :  { %v210_v32 = vmul.f32 %v807_v22, %v209_v26 }
 0x1d0   :  { %v809_v28 = vpop.eup %808 }
 0x1d1   :  { %v811_v29 = vpop.eup %810  ;;  %v214_v30 = vadd.f32 1.0, %v809_v28  ;;  %v217_v33 = vmul.f32 -0.5, %v809_v28  ;;  %v220_v38 = vand.u32 2147483647, %v809_v28 }
 0x1d2   :  { %v207_v31 = vmul.f32 0.6931472, %v811_v29 }
 0x1d3   :  { %812 = vlog2.f32 %v214_v30  ;;  %v218_v36 = vadd.f32 1.0, %v217_v33  ;;  %vm221_vm10 = vcmp.lt.f32.partialorder %v220_v38, 0.0004427343  ;;  %v725_v33 = vld [vmem:[%s1318_s2 + $0x270] sm:$0xff]  ;;  %v720_v38 = vld [vmem:[%s1318_s2 + $0x248] sm:$0xff] }
 0x1d4   :  { %v213_v34 = vsel %vm212_vm8, %v210_v32, %v207_v31  ;;  %v726_v32 = vld [vmem:[%s1318_s2 + $0x278] sm:$0xff] }
 0x1d5   :  { %v223_v35 = vmul.f32 0.01, %v213_v34  ;;  %v219_v43 = vmul.f32 %v809_v28, %v218_v36  ;;  %410 = vmatpush.msrb.mxu0 %v726_v32  ;;  %v724_v34 = vld [vmem:[%s1318_s2 + $0x268] sm:$0xff]  ;;  %v722_v36 = vld [vmem:[%s1318_s2 + $0x258] sm:$0xff]  ;;  %v729_v32 = vld [vmem:[%s1318_s2 + $0x290] sm:$0xff] }
 0x1d7   :  { %v227_v37 = vsel %vm225_vm9, %v192_v14, %v223_v35  ;;  %411 = vmatpush.msrb.mxu0 %v725_v33  ;;  %v723_v35 = vld [vmem:[%s1318_s2 + $0x260] sm:$0xff]  ;;  %v728_v33 = vld [vmem:[%s1318_s2 + $0x288] sm:$0xff] }
 0x1d8   :  { %264 = vmatmul.f32.vlgmr.msra.gmra.mxu2 %v227_v37  ;;  %v721_v37 = vld [vmem:[%s1318_s2 + $0x250] sm:$0xff] }
 0x1d9   :  { %v813_v39 = vpop.eup %812  ;;  %412 = vmatpush.msrb.mxu0 %v724_v34  ;;  %v727_v34 = vld [vmem:[%s1318_s2 + $0x280] sm:$0xff] }
 0x1da   :  { %v216_v40 = vmul.f32 0.6931472, %v813_v39  ;;  %v719_v39 = vld [vmem:[%s1318_s2 + $0x240] sm:$0xff] }
 0x1db   :  { %413 = vmatpush.msrb.mxu0 %v723_v35  ;;  %v786_v35 = vld [vmem:[%s1317_s3 + $0x5] ss:$0 sm:$0xff] }
 0x1dc   :  { %v222_v44 = vsel %vm221_vm10, %v219_v43, %v216_v40  ;;  %v718_v40 = vld [vmem:[%s1318_s2 + $0x238] sm:$0xff]  ;;  %v717_v43 = vld [vmem:[%s1318_s2 + $0x230] sm:$0xff] }
 0x1dd   :  { %v224_v45 = vmul.f32 0.01, %v222_v44  ;;  %414 = vmatpush.msrb.mxu0 %v722_v36  ;;  %v716_v44 = vld [vmem:[%s1318_s2 + $0x228] sm:$0xff] }
 0x1df   :  { %v228_v46 = vsel %vm226_vm11, %v195_v19, %v224_v45  ;;  %415 = vmatpush.msrb.mxu0 %v721_v37  ;;  %v715_v45 = vld [vmem:[%s1318_s2 + $0x220] sm:$0xff] }
 0x1e0   :  { %267 = vmatmul.f32.gmra.mxu2 %v228_v46  ;;  %v714_v46 = vld [vmem:[%s1318_s2 + $0x218] sm:$0xff] }
 0x1e1   :  { %416 = vmatpush.msrb.mxu0 %v720_v38 }
 0x1e3   :  { %417 = vmatpush.msrb.mxu0 %v719_v39 }
 0x1e5   :  { %418 = vmatpush.msrb.mxu0 %v718_v40 }
 0x1e7   :  { %419 = vmatpush.msrb.mxu0 %v717_v43 }
 0x1e9   :  { %420 = vmatpush.msrb.mxu0 %v716_v44 }
 0x1eb   :  { %421 = vmatpush.msrb.mxu0 %v715_v45 }
 0x1ed   :  { %422 = vmatpush.msrb.mxu0 %v714_v46 }
 0x1ef   :  { %423 = vmatpush.msrb.mxu0 %v713_v47 }
 0x1f1   :  { %424 = vmatpush.msrb.mxu0 %v712_v48 }
 0x1f3   :  { %425 = vmatpush.msrb.mxu0 %v711_v49 }
 0x25b   :  { %v265_v0 = vpop.f32.mrf.mxu2 }
 0x25c   :  { %v266_v1 = vadd.f32 %v784_v63, %v265_v0 }
 0x25e   :  { %v271_v2 = vmul.f32 100.0, %v266_v1 }
 0x260   :  { %v273_v3 = vmin.f32 %v271_v2, 20.0  ;;  %vm299_vm13 = vcmp.gt.f32.partialorder %v271_v2, 20.0 }
 0x262   :  { %v275_v4 = vmul.f32 1.442695, %v273_v3 }
 0x263   :  { %v268_v5 = vpop.f32.mrf.mxu2 }
 0x264   :  { %814 = vpow2.f32 %v275_v4  ;;  %v269_v6 = vadd.f32 %v784_v63, %v268_v5 }
 0x266   :  { %v272_v7 = vmul.f32 100.0, %v269_v6 }
 0x268   :  { %v274_v8 = vmin.f32 %v272_v7, 20.0  ;;  %vm300_vm15 = vcmp.gt.f32.partialorder %v272_v7, 20.0 }
 0x26a   :  { %v815_v9 = vpop.eup %814  ;;  %v277_v10 = vmul.f32 1.442695, %v274_v8 }
 0x26b   :  { %v279_v11 = vadd.f32 1.0, %v815_v9  ;;  %v282_v12 = vmul.f32 -0.5, %v815_v9  ;;  %v285_v14 = vand.u32 2147483647, %v815_v9 }
 0x26c   :  { %816 = vpow2.f32 %v277_v10 }
 0x26d   :  { %818 = vlog2.f32 %v279_v11  ;;  %v283_v13 = vadd.f32 1.0, %v282_v12  ;;  %vm286_vm12 = vcmp.lt.f32.partialorder %v285_v14, 0.0004427343 }
 0x26f   :  { %v284_v19 = vmul.f32 %v815_v9, %v283_v13 }
 0x272   :  { %v817_v15 = vpop.eup %816 }
 0x273   :  { %v819_v16 = vpop.eup %818  ;;  %v288_v17 = vadd.f32 1.0, %v817_v15  ;;  %v291_v20 = vmul.f32 -0.5, %v817_v15  ;;  %v294_v25 = vand.u32 2147483647, %v817_v15 }
 0x274   :  { %v281_v18 = vmul.f32 0.6931472, %v819_v16 }
 0x275   :  { %820 = vlog2.f32 %v288_v17  ;;  %v292_v23 = vadd.f32 1.0, %v291_v20  ;;  %vm295_vm14 = vcmp.lt.f32.partialorder %v294_v25, 0.0004427343  ;;  %v741_v20 = vld [vmem:[%s1318_s2 + $0x2f0] sm:$0xff]  ;;  %v736_v25 = vld [vmem:[%s1318_s2 + $0x2c8] sm:$0xff] }
 0x276   :  { %v287_v21 = vsel %vm286_vm12, %v284_v19, %v281_v18  ;;  %v742_v19 = vld [vmem:[%s1318_s2 + $0x2f8] sm:$0xff] }
 0x277   :  { %v297_v22 = vmul.f32 0.01, %v287_v21  ;;  %v293_v28 = vmul.f32 %v817_v15, %v292_v23  ;;  %484 = vmatpush.msrb.mxu1 %v742_v19  ;;  %v740_v21 = vld [vmem:[%s1318_s2 + $0x2e8] sm:$0xff]  ;;  %v738_v23 = vld [vmem:[%s1318_s2 + $0x2d8] sm:$0xff]  ;;  %v743_v19 = vld [vmem:[%s1318_s2 + $0x300] sm:$0xff] }
 0x279   :  { %v301_v24 = vsel %vm299_vm13, %v266_v1, %v297_v22  ;;  %485 = vmatpush.msrb.mxu1 %v741_v20  ;;  %v739_v22 = vld [vmem:[%s1318_s2 + $0x2e0] sm:$0xff] }
 0x27a   :  { %346 = vmatmul.f32.vlgmr.msra.gmra.mxu3 %v301_v24  ;;  %v737_v24 = vld [vmem:[%s1318_s2 + $0x2d0] sm:$0xff]  ;;  %v787_v20 = vld [vmem:[%s1317_s3 + $0x6] ss:$0 sm:$0xff] }
 0x27b   :  { %v821_v26 = vpop.eup %820  ;;  %486 = vmatpush.msrb.mxu1 %v740_v21 }
 0x27c   :  { %v290_v27 = vmul.f32 0.6931472, %v821_v26  ;;  %v735_v26 = vld [vmem:[%s1318_s2 + $0x2c0] sm:$0xff] }
 0x27d   :  { %487 = vmatpush.msrb.mxu1 %v739_v22 }
 0x27e   :  { %v296_v29 = vsel %vm295_vm14, %v293_v28, %v290_v27  ;;  %v734_v27 = vld [vmem:[%s1318_s2 + $0x2b8] sm:$0xff]  ;;  %v733_v28 = vld [vmem:[%s1318_s2 + $0x2b0] sm:$0xff] }
 0x27f   :  { %v298_v30 = vmul.f32 0.01, %v296_v29  ;;  %488 = vmatpush.msrb.mxu1 %v738_v23  ;;  %v732_v29 = vld [vmem:[%s1318_s2 + $0x2a8] sm:$0xff] }
 0x281   :  { %v302_v31 = vsel %vm300_vm15, %v269_v6, %v298_v30  ;;  %489 = vmatpush.msrb.mxu1 %v737_v24  ;;  %v731_v30 = vld [vmem:[%s1318_s2 + $0x2a0] sm:$0xff] }
 0x282   :  { %349 = vmatmul.f32.gmra.mxu3 %v302_v31  ;;  %v730_v31 = vld [vmem:[%s1318_s2 + $0x298] sm:$0xff] }
 0x283   :  { %490 = vmatpush.msrb.mxu1 %v736_v25 }
 0x285   :  { %491 = vmatpush.msrb.mxu1 %v735_v26 }
 0x287   :  { %492 = vmatpush.msrb.mxu1 %v734_v27 }
 0x289   :  { %493 = vmatpush.msrb.mxu1 %v733_v28 }
 0x28b   :  { %494 = vmatpush.msrb.mxu1 %v732_v29 }
 0x28d   :  { %495 = vmatpush.msrb.mxu1 %v731_v30 }
 0x28f   :  { %496 = vmatpush.msrb.mxu1 %v730_v31 }
 0x291   :  { %497 = vmatpush.msrb.mxu1 %v729_v32 }
 0x293   :  { %498 = vmatpush.msrb.mxu1 %v728_v33 }
 0x295   :  { %499 = vmatpush.msrb.mxu1 %v727_v34 }
 0x2fd   :  { %v347_v51 = vpop.f32.mrf.mxu3 }
 0x2fe   :  { %v353_v52 = vadd.f32 %v347_v51, %v944_v41 }
 0x300   :  { %v357_v53 = vadd.f32 %v785_v50, %v353_v52 }
 0x302   :  { %v359_v54 = vmul.f32 100.0, %v357_v53 }
 0x304   :  { %v361_v55 = vmin.f32 %v359_v54, 20.0  ;;  %vm387_vm1 = vcmp.gt.f32.partialorder %v359_v54, 20.0 }
 0x305   :  { %v350_v56 = vpop.f32.mrf.mxu3 }
 0x306   :  { %v363_v57 = vmul.f32 1.442695, %v361_v55  ;;  %v354_v58 = vadd.f32 %v350_v56, %v946_v42 }
 0x308   :  { %822 = vpow2.f32 %v363_v57  ;;  %v358_v59 = vadd.f32 %v785_v50, %v354_v58 }
 0x30a   :  { %v360_v60 = vmul.f32 100.0, %v358_v59 }
 0x30c   :  { %v362_v61 = vmin.f32 %v360_v60, 20.0  ;;  %vm388_vm3 = vcmp.gt.f32.partialorder %v360_v60, 20.0 }
 0x30e   :  { %v823_v62 = vpop.eup %822  ;;  %v365_v63 = vmul.f32 1.442695, %v362_v61 }
 0x30f   :  { %v367_v0 = vadd.f32 1.0, %v823_v62  ;;  %v370_v1 = vmul.f32 -0.5, %v823_v62  ;;  %v373_v41 = vand.u32 2147483647, %v823_v62 }
 0x310   :  { %824 = vpow2.f32 %v365_v63 }
 0x311   :  { %826 = vlog2.f32 %v367_v0  ;;  %v371_v2 = vadd.f32 1.0, %v370_v1  ;;  %vm374_vm0 = vcmp.lt.f32.partialorder %v373_v41, 0.0004427343 }
 0x313   :  { %v372_v7 = vmul.f32 %v823_v62, %v371_v2 }
 0x316   :  { %v825_v3 = vpop.eup %824 }
 0x317   :  { %v827_v4 = vpop.eup %826  ;;  %v376_v5 = vadd.f32 1.0, %v825_v3  ;;  %v379_v8 = vmul.f32 -0.5, %v825_v3  ;;  %v382_v12 = vand.u32 2147483647, %v825_v3 }
 0x318   :  { %v369_v6 = vmul.f32 0.6931472, %v827_v4 }
 0x319   :  { %828 = vlog2.f32 %v376_v5  ;;  %v380_v10 = vadd.f32 1.0, %v379_v8  ;;  %vm383_vm2 = vcmp.lt.f32.partialorder %v382_v12, 0.0004427343  ;;  %v758_v5 = vld [vmem:[%s1318_s2 + $0x378] sm:$0xff]  ;;  %v755_v8 = vld [vmem:[%s1318_s2 + $0x360] sm:$0xff] }
 0x31a   :  { %v375_v42 = vsel %vm374_vm0, %v372_v7, %v369_v6  ;;  %558 = vmatpush.msrb.mxu2 %v758_v5  ;;  %v757_v6 = vld [vmem:[%s1318_s2 + $0x370] sm:$0xff]  ;;  %v756_v7 = vld [vmem:[%s1318_s2 + $0x368] sm:$0xff]  ;;  %v750_v12 = vld [vmem:[%s1318_s2 + $0x338] sm:$0xff]  ;;  %vm655_vm0 = vcmask 7168  }
 0x31b   :  { %v385_v9 = vmul.f32 0.01, %v375_v42  ;;  %v381_v15 = vmul.f32 %v825_v3, %v380_v10  ;;  %v754_v42 = vld [vmem:[%s1318_s2 + $0x358] sm:$0xff]  ;;  %v752_v10 = vld [vmem:[%s1318_s2 + $0x348] sm:$0xff]  ;;  %v759_v5 = vld [vmem:[%s1318_s2 + $0x380] sm:$0xff] }
 0x31c   :  { %559 = vmatpush.msrb.mxu2 %v757_v6  ;;  %v788_v6 = vld [vmem:[%s1317_s3 + $0x7] ss:$0 sm:$0xff] }
 0x31d   :  { %v389_v11 = vsel %vm387_vm1, %v357_v53, %v385_v9  ;;  %v753_v9 = vld [vmem:[%s1318_s2 + $0x350] sm:$0xff] }
 0x31e   :  { %426 = vmatmul.f32.vlgmr.msrb.gmra.mxu0 %v389_v11  ;;  %560 = vmatpush.msrb.mxu2 %v756_v7  ;;  %v751_v11 = vld [vmem:[%s1318_s2 + $0x340] sm:$0xff] }
 0x31f   :  { %v829_v13 = vpop.eup %828 }
 0x320   :  { %v378_v14 = vmul.f32 0.6931472, %v829_v13  ;;  %561 = vmatpush.msrb.mxu2 %v755_v8  ;;  %v749_v13 = vld [vmem:[%s1318_s2 + $0x330] sm:$0xff] }
 0x322   :  { %v384_v16 = vsel %vm383_vm2, %v381_v15, %v378_v14  ;;  %562 = vmatpush.msrb.mxu2 %v754_v42  ;;  %v748_v14 = vld [vmem:[%s1318_s2 + $0x328] sm:$0xff]  ;;  %v747_v15 = vld [vmem:[%s1318_s2 + $0x320] sm:$0xff] }
 0x323   :  { %v386_v17 = vmul.f32 0.01, %v384_v16  ;;  %v746_v16 = vld [vmem:[%s1318_s2 + $0x318] sm:$0xff] }
 0x324   :  { %563 = vmatpush.msrb.mxu2 %v753_v9 }
 0x325   :  { %v390_v18 = vsel %vm388_vm3, %v358_v59, %v386_v17  ;;  %v745_v17 = vld [vmem:[%s1318_s2 + $0x310] sm:$0xff] }
 0x326   :  { %429 = vmatmul.f32.gmra.mxu0 %v390_v18  ;;  %564 = vmatpush.msrb.mxu2 %v752_v10  ;;  %v744_v18 = vld [vmem:[%s1318_s2 + $0x308] sm:$0xff] }
 0x328   :  { %565 = vmatpush.msrb.mxu2 %v751_v11 }
 0x32a   :  { %566 = vmatpush.msrb.mxu2 %v750_v12 }
 0x32c   :  { %567 = vmatpush.msrb.mxu2 %v749_v13 }
 0x32e   :  { %568 = vmatpush.msrb.mxu2 %v748_v14 }
 0x330   :  { %569 = vmatpush.msrb.mxu2 %v747_v15 }
 0x332   :  { %570 = vmatpush.msrb.mxu2 %v746_v16 }
 0x334   :  { %571 = vmatpush.msrb.mxu2 %v745_v17 }
 0x336   :  { %572 = vmatpush.msrb.mxu2 %v744_v18 }
 0x338   :  { %573 = vmatpush.msrb.mxu2 %v743_v19 }
 0x39b   :  { %v427_v36 = vpop.f32.mrf.mxu0 }
 0x39c   :  { %v428_v37 = vadd.f32 %v786_v35, %v427_v36 }
 0x39e   :  { %v433_v38 = vmul.f32 100.0, %v428_v37 }
 0x3a0   :  { %v435_v39 = vmin.f32 %v433_v38, 20.0  ;;  %vm461_vm5 = vcmp.gt.f32.partialorder %v433_v38, 20.0 }
 0x3a2   :  { %v437_v40 = vmul.f32 1.442695, %v435_v39 }
 0x3a3   :  { %v430_v43 = vpop.f32.mrf.mxu0 }
 0x3a4   :  { %830 = vpow2.f32 %v437_v40  ;;  %v431_v44 = vadd.f32 %v786_v35, %v430_v43 }
 0x3a6   :  { %v434_v45 = vmul.f32 100.0, %v431_v44 }
 0x3a8   :  { %v436_v46 = vmin.f32 %v434_v45, 20.0  ;;  %vm462_vm7 = vcmp.gt.f32.partialorder %v434_v45, 20.0 }
 0x3aa   :  { %v831_v47 = vpop.eup %830  ;;  %v439_v48 = vmul.f32 1.442695, %v436_v46 }
 0x3ab   :  { %v441_v49 = vadd.f32 1.0, %v831_v47  ;;  %v444_v50 = vmul.f32 -0.5, %v831_v47  ;;  %v447_v52 = vand.u32 2147483647, %v831_v47 }
 0x3ac   :  { %832 = vpow2.f32 %v439_v48 }
 0x3ad   :  { %834 = vlog2.f32 %v441_v49  ;;  %v445_v51 = vadd.f32 1.0, %v444_v50  ;;  %vm448_vm4 = vcmp.lt.f32.partialorder %v447_v52, 0.0004427343 }
 0x3af   :  { %v446_v57 = vmul.f32 %v831_v47, %v445_v51 }
 0x3b2   :  { %v833_v53 = vpop.eup %832 }
 0x3b3   :  { %v835_v54 = vpop.eup %834  ;;  %v450_v55 = vadd.f32 1.0, %v833_v53  ;;  %v453_v58 = vmul.f32 -0.5, %v833_v53  ;;  %v456_v63 = vand.u32 2147483647, %v833_v53 }
 0x3b4   :  { %v443_v56 = vmul.f32 0.6931472, %v835_v54 }
 0x3b5   :  { %836 = vlog2.f32 %v450_v55  ;;  %v454_v61 = vadd.f32 1.0, %v453_v58  ;;  %vm457_vm6 = vcmp.lt.f32.partialorder %v456_v63, 0.0004427343  ;;  %v774_v55 = vld [vmem:[%s1318_s2 + $0x3f8] sm:$0xff]  ;;  %v771_v58 = vld [vmem:[%s1318_s2 + $0x3e0] sm:$0xff] }
 0x3b6   :  { %v449_v59 = vsel %vm448_vm4, %v446_v57, %v443_v56  ;;  %632 = vmatpush.msrb.mxu3 %v774_v55  ;;  %v773_v56 = vld [vmem:[%s1318_s2 + $0x3f0] sm:$0xff]  ;;  %v772_v57 = vld [vmem:[%s1318_s2 + $0x3e8] sm:$0xff]  ;;  %v766_v63 = vld [vmem:[%s1318_s2 + $0x3b8] sm:$0xff] }
 0x3b7   :  { %v459_v60 = vmul.f32 0.01, %v449_v59  ;;  %v455_v2 = vmul.f32 %v833_v53, %v454_v61  ;;  %v770_v59 = vld [vmem:[%s1318_s2 + $0x3d8] sm:$0xff]  ;;  %v768_v61 = vld [vmem:[%s1318_s2 + $0x3c8] sm:$0xff] }
 0x3b8   :  { %633 = vmatpush.msrb.mxu3 %v773_v56 }
 0x3b9   :  { %v463_v62 = vsel %vm461_vm5, %v428_v37, %v459_v60  ;;  %v769_v60 = vld [vmem:[%s1318_s2 + $0x3d0] sm:$0xff] }
 0x3ba   :  { %500 = vmatmul.f32.vlgmr.msrb.gmra.mxu1 %v463_v62  ;;  %634 = vmatpush.msrb.mxu3 %v772_v57  ;;  %v767_v62 = vld [vmem:[%s1318_s2 + $0x3c0] sm:$0xff] }
 0x3bb   :  { %v837_v0 = vpop.eup %836 }
 0x3bc   :  { %v452_v1 = vmul.f32 0.6931472, %v837_v0  ;;  %635 = vmatpush.msrb.mxu3 %v771_v58  ;;  %v765_v0 = vld [vmem:[%s1318_s2 + $0x3b0] sm:$0xff] }
 0x3be   :  { %v458_v41 = vsel %vm457_vm6, %v455_v2, %v452_v1  ;;  %636 = vmatpush.msrb.mxu3 %v770_v59  ;;  %v764_v1 = vld [vmem:[%s1318_s2 + $0x3a8] sm:$0xff]  ;;  %v763_v2 = vld [vmem:[%s1318_s2 + $0x3a0] sm:$0xff] }
 0x3bf   :  { %v460_v3 = vmul.f32 0.01, %v458_v41  ;;  %v762_v41 = vld [vmem:[%s1318_s2 + $0x398] sm:$0xff] }
 0x3c0   :  { %637 = vmatpush.msrb.mxu3 %v769_v60 }
 0x3c1   :  { %v464_v4 = vsel %vm462_vm7, %v431_v44, %v460_v3  ;;  %v761_v3 = vld [vmem:[%s1318_s2 + $0x390] sm:$0xff] }
 0x3c2   :  { %503 = vmatmul.f32.gmra.mxu1 %v464_v4  ;;  %638 = vmatpush.msrb.mxu3 %v768_v61  ;;  %v760_v4 = vld [vmem:[%s1318_s2 + $0x388] sm:$0xff] }
 0x3c4   :  { %639 = vmatpush.msrb.mxu3 %v767_v62 }
 0x3c6   :  { %640 = vmatpush.msrb.mxu3 %v766_v63 }
 0x3c8   :  { %641 = vmatpush.msrb.mxu3 %v765_v0 }
 0x3ca   :  { %642 = vmatpush.msrb.mxu3 %v764_v1 }
 0x3cc   :  { %643 = vmatpush.msrb.mxu3 %v763_v2 }
 0x3ce   :  { %644 = vmatpush.msrb.mxu3 %v762_v41 }
 0x3d0   :  { %645 = vmatpush.msrb.mxu3 %v761_v3 }
 0x3d2   :  { %646 = vmatpush.msrb.mxu3 %v760_v4 }
 0x3d4   :  { %647 = vmatpush.msrb.mxu3 %v759_v5 }
 0x437   :  { %v501_v21 = vpop.f32.mrf.mxu1 }
 0x438   :  { %v502_v22 = vadd.f32 %v787_v20, %v501_v21 }
 0x43a   :  { %v507_v23 = vmul.f32 100.0, %v502_v22 }
 0x43c   :  { %v509_v24 = vmin.f32 %v507_v23, 20.0  ;;  %vm535_vm9 = vcmp.gt.f32.partialorder %v507_v23, 20.0 }
 0x43e   :  { %v511_v25 = vmul.f32 1.442695, %v509_v24 }
 0x43f   :  { %v504_v26 = vpop.f32.mrf.mxu1 }
 0x440   :  { %838 = vpow2.f32 %v511_v25  ;;  %v505_v27 = vadd.f32 %v787_v20, %v504_v26 }
 0x442   :  { %v508_v28 = vmul.f32 100.0, %v505_v27 }
 0x444   :  { %v510_v29 = vmin.f32 %v508_v28, 20.0  ;;  %vm536_vm11 = vcmp.gt.f32.partialorder %v508_v28, 20.0 }
 0x446   :  { %v839_v30 = vpop.eup %838  ;;  %v513_v31 = vmul.f32 1.442695, %v510_v29 }
 0x447   :  { %v515_v32 = vadd.f32 1.0, %v839_v30  ;;  %v518_v33 = vmul.f32 -0.5, %v839_v30  ;;  %v521_v35 = vand.u32 2147483647, %v839_v30 }
 0x448   :  { %840 = vpow2.f32 %v513_v31 }
 0x449   :  { %842 = vlog2.f32 %v515_v32  ;;  %v519_v34 = vadd.f32 1.0, %v518_v33  ;;  %vm522_vm8 = vcmp.lt.f32.partialorder %v521_v35, 0.0004427343 }
 0x44b   :  { %v520_v40 = vmul.f32 %v839_v30, %v519_v34 }
 0x44e   :  { %v841_v36 = vpop.eup %840 }
 0x44f   :  { %v843_v37 = vpop.eup %842  ;;  %v524_v38 = vadd.f32 1.0, %v841_v36  ;;  %v527_v43 = vmul.f32 -0.5, %v841_v36  ;;  %v530_v48 = vand.u32 2147483647, %v841_v36 }
 0x450   :  { %v517_v39 = vmul.f32 0.6931472, %v843_v37 }
 0x451   :  { %844 = vlog2.f32 %v524_v38  ;;  %v528_v46 = vadd.f32 1.0, %v527_v43  ;;  %vm531_vm10 = vcmp.lt.f32.partialorder %v530_v48, 0.0004427343  ;;  %v789_v38 = vld [vmem:[%s1317_s3 + $0x8] ss:$0 sm:$0xff] }
 0x452   :  { %v523_v44 = vsel %vm522_vm8, %v520_v40, %v517_v39 }
 0x453   :  { %v533_v45 = vmul.f32 0.01, %v523_v44  ;;  %v529_v51 = vmul.f32 %v841_v36, %v528_v46 }
 0x455   :  { %v537_v47 = vsel %vm535_vm9, %v502_v22, %v533_v45 }
 0x456   :  { %574 = vmatmul.f32.vlgmr.msrb.gmra.mxu2 %v537_v47 }
 0x457   :  { %v845_v49 = vpop.eup %844 }
 0x458   :  { %v526_v50 = vmul.f32 0.6931472, %v845_v49 }
 0x45a   :  { %v532_v52 = vsel %vm531_vm10, %v529_v51, %v526_v50 }
 0x45b   :  { %v534_v53 = vmul.f32 0.01, %v532_v52 }
 0x45d   :  { %v538_v54 = vsel %vm536_vm11, %v505_v27, %v534_v53 }
 0x45e   :  { %577 = vmatmul.f32.gmra.mxu2 %v538_v54 }
 0x4d9   :  { %v575_v7 = vpop.f32.mrf.mxu2 }
 0x4da   :  { %v576_v8 = vadd.f32 %v788_v6, %v575_v7 }
 0x4dc   :  { %v581_v42 = vmul.f32 100.0, %v576_v8 }
 0x4de   :  { %v583_v9 = vmin.f32 %v581_v42, 20.0  ;;  %vm609_vm13 = vcmp.gt.f32.partialorder %v581_v42, 20.0 }
 0x4e0   :  { %v585_v10 = vmul.f32 1.442695, %v583_v9 }
 0x4e1   :  { %v578_v11 = vpop.f32.mrf.mxu2 }
 0x4e2   :  { %846 = vpow2.f32 %v585_v10  ;;  %v579_v12 = vadd.f32 %v788_v6, %v578_v11 }
 0x4e4   :  { %v582_v13 = vmul.f32 100.0, %v579_v12 }
 0x4e6   :  { %v584_v14 = vmin.f32 %v582_v13, 20.0  ;;  %vm610_vm15 = vcmp.gt.f32.partialorder %v582_v13, 20.0 }
 0x4e8   :  { %v847_v15 = vpop.eup %846  ;;  %v587_v16 = vmul.f32 1.442695, %v584_v14 }
 0x4e9   :  { %v589_v17 = vadd.f32 1.0, %v847_v15  ;;  %v592_v18 = vmul.f32 -0.5, %v847_v15  ;;  %v595_v20 = vand.u32 2147483647, %v847_v15 }
 0x4ea   :  { %848 = vpow2.f32 %v587_v16 }
 0x4eb   :  { %850 = vlog2.f32 %v589_v17  ;;  %v593_v19 = vadd.f32 1.0, %v592_v18  ;;  %vm596_vm12 = vcmp.lt.f32.partialorder %v595_v20, 0.0004427343 }
 0x4ed   :  { %v594_v25 = vmul.f32 %v847_v15, %v593_v19 }
 0x4f0   :  { %v849_v21 = vpop.eup %848 }
 0x4f1   :  { %v851_v22 = vpop.eup %850  ;;  %v598_v23 = vadd.f32 1.0, %v849_v21  ;;  %v601_v26 = vmul.f32 -0.5, %v849_v21  ;;  %v604_v31 = vand.u32 2147483647, %v849_v21 }
 0x4f2   :  { %v591_v24 = vmul.f32 0.6931472, %v851_v22 }
 0x4f3   :  { %852 = vlog2.f32 %v598_v23  ;;  %v602_v29 = vadd.f32 1.0, %v601_v26  ;;  %vm605_vm14 = vcmp.lt.f32.partialorder %v604_v31, 0.0004427343 }
 0x4f4   :  { %v597_v27 = vsel %vm596_vm12, %v594_v25, %v591_v24 }
 0x4f5   :  { %v607_v28 = vmul.f32 0.01, %v597_v27  ;;  %v603_v34 = vmul.f32 %v849_v21, %v602_v29 }
 0x4f7   :  { %v611_v30 = vsel %vm609_vm13, %v576_v8, %v607_v28 }
 0x4f8   :  { %648 = vmatmul.f32.vlgmr.msrb.gmra.mxu3 %v611_v30 }
 0x4f9   :  { %v853_v32 = vpop.eup %852 }
 0x4fa   :  { %v600_v33 = vmul.f32 0.6931472, %v853_v32 }
 0x4fc   :  { %v606_v35 = vsel %vm605_vm14, %v603_v34, %v600_v33 }
 0x4fd   :  { %v608_v36 = vmul.f32 0.01, %v606_v35 }
 0x4ff   :  { %v612_v37 = vsel %vm610_vm15, %v579_v12, %v608_v36 }
 0x500   :  { %651 = vmatmul.f32.gmra.mxu3 %v612_v37 }
 0x57b   :  { %v649_v39 = vpop.f32.mrf.mxu3 }
 0x57c   :  { %v650_v40 = vadd.f32 %v789_v38, %v649_v39 }
 0x57e   :  { %656 = vst.msk [vmem:[%s1320_s4] sm:$0xff] %vm655_vm0, %v650_v40 }
 0x583   :  { %v652_v43 = vpop.f32.mrf.mxu3 }
 0x584   :  { %v653_v44 = vadd.f32 %v789_v38, %v652_v43 }
 0x586   :  { %657 = vst.msk [vmem:[%s1320_s4 + $0x8] sm:$0xff] %vm655_vm0, %v653_v44 }

</bundles_post_ra>
